<compile_context>
chip_gen: v6e
topology: v6e:2x2x1
jax: 0.10.0
libtpu: 0.0.40
codegen_flags: <defaults>
</compile_context>

<pallas_src>
import functools

import jax
import jax.numpy as jnp
from jax.experimental import pallas as pl
from jax.experimental.pallas import tpu as pltpu


# --------------------------------------------------------------------------
# In-kernel accumulation helpers (streamed, 128 lanes at a time)
# --------------------------------------------------------------------------
def _accum_fast(x_ref, sum_acc, max_acc, chunk):
    """Unmasked accumulation of a fully-valid chunk, streamed per 128 lanes."""
    ps = x_ref[0, :, 0:128].astype(jnp.float32)
    pm = ps
    for j in range(1, chunk // 128):
        xj = x_ref[0, :, j * 128:(j + 1) * 128].astype(jnp.float32)
        ps = ps + xj
        pm = jnp.maximum(pm, xj)
    sum_acc[...] = sum_acc[...] + ps
    max_acc[...] = jnp.maximum(max_acc[...], pm)


def _accum_masked(x_ref, sum_acc, max_acc, rem):
    """Final-chunk accumulation when only the first `rem` lanes are valid
    (0 < rem < chunk).  Only the single partially-valid 128-lane slice is
    masked; fully-invalid slices are skipped entirely."""
    n_full = rem // 128
    partial = rem % 128
    ps = pm = None
    for j in range(n_full):
        xj = x_ref[0, :, j * 128:(j + 1) * 128].astype(jnp.float32)
        if ps is None:
            ps, pm = xj, xj
        else:
            ps = ps + xj
            pm = jnp.maximum(pm, xj)
    if partial:
        xj = x_ref[0, :, n_full * 128:(n_full + 1) * 128].astype(jnp.float32)
        lane = jax.lax.broadcasted_iota(jnp.int32, xj.shape, 1)
        valid = lane < partial
        xs = jnp.where(valid, xj, 0.0)
        xm = jnp.where(valid, xj, -jnp.inf)
        if ps is None:
            ps, pm = xs, xm
        else:
            ps = ps + xs
            pm = jnp.maximum(pm, xm)
    sum_acc[...] = sum_acc[...] + ps
    max_acc[...] = jnp.maximum(max_acc[...], pm)


def _accum_chunk(x_ref, sum_acc, max_acc, k, *, hw, chunk, n_chunks):
    """Accumulate the current HW chunk into the running (sum, max) scratch."""
    if chunk % 128 != 0:
        # Single full-extent chunk (n_chunks == 1) whose width is not a
        # multiple of 128: no padded lanes exist, let Mosaic do the reduce.
        x = x_ref[0].astype(jnp.float32)
        sum_acc[:, 0:1] = sum_acc[:, 0:1] + jnp.sum(x, axis=-1, keepdims=True)
        max_acc[:, 0:1] = jnp.maximum(max_acc[:, 0:1],
                                      jnp.max(x, axis=-1, keepdims=True))
    elif hw % chunk == 0:
        _accum_fast(x_ref, sum_acc, max_acc, chunk)
    else:
        rem = hw - (n_chunks - 1) * chunk  # static, 0 < rem < chunk

        @pl.when(k < n_chunks - 1)
        def _():
            _accum_fast(x_ref, sum_acc, max_acc, chunk)

        @pl.when(k == n_chunks - 1)
        def _():
            _accum_masked(x_ref, sum_acc, max_acc, rem)


# --------------------------------------------------------------------------
# Kernels
# --------------------------------------------------------------------------
def _pool_mlp_kernel(x_ref, w1t_ref, b1_ref, w2t_ref, b2_ref, o_ref,
                     sum_acc, max_acc, *, hw, chunk, n_chunks):
    """Fused avg/max pool + shared MLP + sigmoid for one batch element.

    x_ref : (1, C, chunk) block of the (N, C, HW) input
    o_ref : (1, 1, C) attention weights, written on the last chunk
    sum_acc/max_acc : (C, 128) f32 running per-lane partials
    """
    k = pl.program_id(1)

    @pl.when(k == 0)
    def _init():
        sum_acc[...] = jnp.zeros_like(sum_acc)
        max_acc[...] = jnp.full_like(max_acc, -jnp.inf)

    _accum_chunk(x_ref, sum_acc, max_acc, k, hw=hw, chunk=chunk,
                 n_chunks=n_chunks)

    @pl.when(k == n_chunks - 1)
    def _finalize():
        avg = jnp.sum(sum_acc[...], axis=-1, keepdims=True) * (1.0 / hw)  # (C,1)
        mx = jnp.max(max_acc[...], axis=-1, keepdims=True)                # (C,1)
        p = jnp.concatenate([avg.T, mx.T], axis=0)                        # (2,C)
        h = jnp.dot(p, w1t_ref[...], preferred_element_type=jnp.float32) + b1_ref[...]
        h = jnp.maximum(h, 0.0)                                           # ReLU
        out = jnp.dot(h, w2t_ref[...], preferred_element_type=jnp.float32) + b2_ref[...]
        o_ref[0, 0:1, :] = jax.nn.sigmoid(out[0:1, :] + out[1:2, :])


def _pool_kernel(x_ref, o_ref, sum_acc, max_acc, *, hw, chunk, n_chunks):
    """Fused global sum+max pooling over the spatial axis (one channel tile).

    x_ref : (1, c_tile, chunk)
    o_ref : (1, 2, c_tile) f32 — row 0 = mean, row 1 = max
    """
    k = pl.program_id(2)

    @pl.when(k == 0)
    def _init():
        sum_acc[...] = jnp.zeros_like(sum_acc)
        max_acc[...] = jnp.full_like(max_acc, -jnp.inf)

    _accum_chunk(x_ref, sum_acc, max_acc, k, hw=hw, chunk=chunk,
                 n_chunks=n_chunks)

    @pl.when(k == n_chunks - 1)
    def _finalize():
        avg = jnp.sum(sum_acc[...], axis=-1, keepdims=True) * (1.0 / hw)
        mx = jnp.max(max_acc[...], axis=-1, keepdims=True)
        o_ref[0, 0:1, :] = avg.T
        o_ref[0, 1:2, :] = mx.T


# --------------------------------------------------------------------------
# Wrapper
# --------------------------------------------------------------------------
def _tpu_vmem_capacity_bytes():
    try:
        return int(pltpu.get_tpu_info().vmem_capacity_bytes)
    except Exception:
        return 64 * 1024 * 1024  # conservative (v7x-sized) fallback


def _pick_c_tile(C):
    """Channel tile: full C when small, else a multiple-of-8 divisor <= 256."""
    if C <= 256:
        return C
    if C % 128 == 0:
        return 128
    best = 0
    for d in range(8, 257, 8):
        if C % d == 0:
            best = d
    return best if best >= 64 else C  # fallback: full C (chunk shrinks to fit)


def channel_attention(x, w1, b1, w2, b2, *, max_chunk=None):
    """CBAM channel attention.

    x  : (N, C, H, W) f32 or bf16
    w1 : (Cr, C) fc1 = Conv2d(C, Cr, 1) weight squeezed; b1 : (Cr,)
    w2 : (C, Cr) fc2 = Conv2d(Cr, C, 1) weight squeezed; b2 : (C,)
    Returns (N, C, 1, 1) attention weights.
    """
    N, C, H, W = x.shape
    HW = H * W
    Cr = w1.shape[0]

    x_flat = x.reshape(N, C, HW)
    itemsize = jnp.dtype(x.dtype).itemsize

    # Generation-aware VMEM budgets: bigger tiles on 128 MiB v5e/v6e,
    # bounded on 64 MiB v7x.
    vmem_cap = _tpu_vmem_capacity_bytes()
    if vmem_cap >= 128 * 1024 * 1024:          # v5e / v6e
        vmem_limit = 96 * 1024 * 1024
        per_buf_budget = 8 * 1024 * 1024       # per input block (x2 dbl-buffer)
    else:                                       # v7x
        vmem_limit = 40 * 1024 * 1024
        per_buf_budget = 4 * 1024 * 1024

    # Channel tiling (extra "parallel" axis; also bounds VMEM for huge C).
    c_tile = _pick_c_tile(C)
    n_ctiles = C // c_tile

    # Spatial chunking: as large as the VMEM budget allows, multiple of 128.
    chunk_cap = max(128, (per_buf_budget // (c_tile * itemsize)) // 128 * 128)
    if max_chunk is not None:
        chunk_cap = min(chunk_cap, max(128, (max_chunk // 128) * 128))
    if HW > chunk_cap:
        chunk = chunk_cap
        n_chunks = pl.cdiv(HW, chunk)
    else:
        chunk = HW
        n_chunks = 1

    w1t = jnp.transpose(w1).astype(jnp.float32)   # (C, Cr)
    w2t = jnp.transpose(w2).astype(jnp.float32)   # (Cr, C)
    b1r = b1.reshape(1, Cr).astype(jnp.float32)
    b2r = b2.reshape(1, C).astype(jnp.float32)

    cost = pl.CostEstimate(
        flops=2 * N * C * HW + 4 * N * C * Cr,
        transcendentals=N * C,
        bytes_accessed=N * C * HW * itemsize + N * 2 * C * 4,
    )

    # TODO(synk): for v7x with N * n_ctiles < 2, a 2-way split of the HW
    # reduction (split-K with partial sum/max outputs) would let both
    # TensorCores share the HBM read; not implemented here.

    if n_ctiles == 1:
        # Single channel tile: fuse the tiny shared MLP into the pool
        # kernel's finalize — one launch, no pooled-stat HBM round trip.
        out = pl.pallas_call(
            functools.partial(_pool_mlp_kernel, hw=HW, chunk=chunk,
                              n_chunks=n_chunks),
            out_shape=jax.ShapeDtypeStruct((N, 1, C), jnp.float32),
            grid=(N, n_chunks),
            in_specs=[
                pl.BlockSpec((1, C, chunk), lambda n, k: (n, 0, k)),
                pl.BlockSpec((C, Cr), lambda n, k: (0, 0)),
                pl.BlockSpec((1, Cr), lambda n, k: (0, 0)),
                pl.BlockSpec((Cr, C), lambda n, k: (0, 0)),
                pl.BlockSpec((1, C), lambda n, k: (0, 0)),
            ],
            out_specs=pl.BlockSpec((1, 1, C), lambda n, k: (n, 0, 0)),
            scratch_shapes=[
                pltpu.VMEM((C, 128), jnp.float32),   # running sum
                pltpu.VMEM((C, 128), jnp.float32),   # running max
            ],
            compiler_params=pltpu.CompilerParams(
                dimension_semantics=("parallel", "arbitrary"),
                vmem_limit_bytes=vmem_limit,
            ),
            cost_estimate=cost,
        )(x_flat, w1t, b1r, w2t, b2r)
        return out.reshape(N, C, 1, 1)

    # Multiple channel tiles: Pallas does the bandwidth-bound pooling; the
    # few-microsecond MLP is left to XLA (no second kernel launch).
    pooled = pl.pallas_call(
        functools.partial(_pool_kernel, hw=HW, chunk=chunk, n_chunks=n_chunks),
        out_shape=jax.ShapeDtypeStruct((N, 2, C), jnp.float32),
        grid=(N, n_ctiles, n_chunks),
        in_specs=[pl.BlockSpec((1, c_tile, chunk), lambda n, c, k: (n, c, k))],
        out_specs=pl.BlockSpec((1, 2, c_tile), lambda n, c, k: (n, 0, c)),
        scratch_shapes=[
            pltpu.VMEM((c_tile, 128), jnp.float32),   # running sum
            pltpu.VMEM((c_tile, 128), jnp.float32),   # running max
        ],
        compiler_params=pltpu.CompilerParams(
            dimension_semantics=("parallel", "parallel", "arbitrary"),
            vmem_limit_bytes=vmem_limit,
        ),
        cost_estimate=cost,
    )(x_flat)

    avg = pooled[:, 0, :]                                 # (N, C)
    mx = pooled[:, 1, :]                                  # (N, C)
    p2 = jnp.concatenate([avg, mx], axis=0)               # (2N, C)
    h = jnp.maximum(p2 @ w1t + b1r, 0.0)                  # (2N, Cr)
    o = h @ w2t + b2r                                     # (2N, C)
    out = jax.nn.sigmoid(o[:N] + o[N:])                   # (N, C)
    return out.reshape(N, C, 1, 1)


def channel_attention_ref(x, w1, b1, w2, b2):
    """Pure-JAX reference matching the PyTorch forward semantics."""
    avg = jnp.mean(x, axis=(2, 3))                      # (N, C)
    mx = jnp.max(x, axis=(2, 3))                        # (N, C)

    def mlp(v):  # v: (N, C)
        h = jnp.maximum(v @ w1.T + b1, 0.0)             # (N, Cr)
        return h @ w2.T + b2                            # (N, C)

    out = jax.nn.sigmoid(mlp(avg) + mlp(mx))            # (N, C)
    return out.reshape(*out.shape, 1, 1)


if __name__ == "__main__":
    # reduction_ratio=16 needs channels >= 16; C=32 gives a hidden width of 2.
    N, C, H, W = 2, 32, 16, 16
    reduction_ratio = 16
    Cr = C // reduction_ratio

    key = jax.random.PRNGKey(0)
    kx, kw1, kb1, kw2, kb2 = jax.random.split(key, 5)

    x = jax.random.normal(kx, (N, C, H, W), dtype=jnp.float32)
    # Conv2d(C, Cr, 1) weight is (Cr, C, 1, 1) -> squeeze to (Cr, C).
    w1 = jax.random.normal(kw1, (Cr, C), dtype=jnp.float32) * 0.1
    b1 = jax.random.normal(kb1, (Cr,), dtype=jnp.float32) * 0.1
    # Conv2d(Cr, C, 1) weight is (C, Cr, 1, 1) -> squeeze to (C, Cr).
    w2 = jax.random.normal(kw2, (C, Cr), dtype=jnp.float32) * 0.1
    b2 = jax.random.normal(kb2, (C,), dtype=jnp.float32) * 0.1

    ref = channel_attention_ref(x, w1, b1, w2, b2)

    # Fused single-chunk path (default auto chunk).
    out = jax.block_until_ready(channel_attention(x, w1, b1, w2, b2))
    assert out.shape == (N, C, 1, 1)
    assert jnp.allclose(out, ref, atol=1e-5, rtol=1e-5)

    # Chunked-HW path (2 chunks of 128 lanes over HW=256), fused MLP.
    out_ck = jax.block_until_ready(channel_attention(x, w1, b1, w2, b2, max_chunk=128))
    assert jnp.allclose(out_ck, ref, atol=1e-5, rtol=1e-5)

    # Remainder-chunk masking path: HW = 14*14 = 196 is not a multiple of 128.
    x2 = jax.random.normal(kx, (N, C, 14, 14), dtype=jnp.float32)
    ref2 = channel_attention_ref(x2, w1, b1, w2, b2)
    out2 = jax.block_until_ready(channel_attention(x2, w1, b1, w2, b2, max_chunk=128))
    assert jnp.allclose(out2, ref2, atol=1e-5, rtol=1e-5)
    # Full-extent, non-multiple-of-128 single-chunk path.
    out2f = jax.block_until_ready(channel_attention(x2, w1, b1, w2, b2))
    assert jnp.allclose(out2f, ref2, atol=1e-5, rtol=1e-5)

    # bf16 input path (halves HBM traffic; accumulation stays f32 in-kernel).
    xb = x.astype(jnp.bfloat16)
    ref_b = channel_attention_ref(xb.astype(jnp.float32), w1, b1, w2, b2)
    out_b = jax.block_until_ready(channel_attention(xb, w1, b1, w2, b2, max_chunk=128))
    assert jnp.allclose(out_b, ref_b, atol=1e-4, rtol=1e-4)

    # Multi-channel-tile (non-fused) path: C=512 -> c_tile=128, n_ctiles=4.
    C2, Cr2 = 512, 512 // reduction_ratio
    x3 = jax.random.normal(kx, (1, C2, 4, 4), dtype=jnp.float32)
    w1b = jax.random.normal(kw1, (Cr2, C2), dtype=jnp.float32) * 0.05
    b1b = jax.random.normal(kb1, (Cr2,), dtype=jnp.float32) * 0.05
    w2b = jax.random.normal(kw2, (C2, Cr2), dtype=jnp.float32) * 0.05
    b2b = jax.random.normal(kb2, (C2,), dtype=jnp.float32) * 0.05
    ref3 = channel_attention_ref(x3, w1b, b1b, w2b, b2b)
    out3 = jax.block_until_ready(channel_attention(x3, w1b, b1b, w2b, b2b))
    assert out3.shape == (1, C2, 1, 1)
    assert jnp.allclose(out3, ref3, atol=1e-5, rtol=1e-5)

    print("KERNEL_OK")
</pallas_src>

<mosaic_0001>
module attributes {stable_mosaic.version = 11 : i64} {
  func.func @_pool_mlp_kernel(%arg0: i32, %arg1: i32, %arg2: memref<1x32x256xf32, #tpu.memory_space<vmem>>, %arg3: memref<32x2xf32, #tpu.memory_space<vmem>>, %arg4: memref<1x2xf32, #tpu.memory_space<vmem>>, %arg5: memref<2x32xf32, #tpu.memory_space<vmem>>, %arg6: memref<1x32xf32, #tpu.memory_space<vmem>>, %arg7: memref<1x1x32xf32, #tpu.memory_space<vmem>>, %arg8: memref<32x128xf32, #tpu.memory_space<vmem>>, %arg9: memref<32x128xf32, #tpu.memory_space<vmem>>) attributes {dimension_semantics = [#tpu.dimension_semantics<parallel>, #tpu.dimension_semantics<arbitrary>], iteration_bounds = array<i64: 2, 1>, scalar_prefetch = 0 : i64, scratch_operands = 2 : i64, tpu.core_type = #tpu.core_type<tc>, window_params = [{transform_indices = @transform_0, window_bounds = array<i64: 1, 32, 256>}, {pipeline_mode = #tpu.pipeline_mode<synchronous>, transform_indices = @transform_1, window_bounds = array<i64: 32, 2>}, {pipeline_mode = #tpu.pipeline_mode<synchronous>, transform_indices = @transform_2, window_bounds = array<i64: 1, 2>}, {pipeline_mode = #tpu.pipeline_mode<synchronous>, transform_indices = @transform_3, window_bounds = array<i64: 2, 32>}, {pipeline_mode = #tpu.pipeline_mode<synchronous>, transform_indices = @transform_4, window_bounds = array<i64: 1, 32>}, {transform_indices = @transform_5, window_bounds = array<i64: 1, 1, 32>}]} {
    %c0_i32 = arith.constant 0 : i32
    %0 = arith.cmpi eq, %arg1, %c0_i32 : i32
    %1 = arith.extui %0 : i1 to i32
    %c0_i32_0 = arith.constant 0 : i32
    %2 = arith.cmpi ne, %1, %c0_i32_0 : i32
    scf.if %2 {
      %cst = arith.constant 0.000000e+00 : f32
      %18 = vector.broadcast %cst : f32 to vector<32x128xf32>
      %c0_15 = arith.constant 0 : index
      %c0_16 = arith.constant 0 : index
      %19 = vector.load %arg8[%c0_15, %c0_16] : memref<32x128xf32, #tpu.memory_space<vmem>>, vector<32x128xf32>
      tpu.vector_store %arg8[%c0_15, %c0_16], %18 {strides = array<i32>} : memref<32x128xf32, #tpu.memory_space<vmem>>, vector<32x128xf32>,
      %cst_17 = arith.constant 0xFF800000 : f32
      %20 = vector.broadcast %cst_17 : f32 to vector<32x128xf32>
      %c0_18 = arith.constant 0 : index
      %c0_19 = arith.constant 0 : index
      %21 = vector.load %arg9[%c0_18, %c0_19] : memref<32x128xf32, #tpu.memory_space<vmem>>, vector<32x128xf32>
      tpu.vector_store %arg9[%c0_18, %c0_19], %20 {strides = array<i32>} : memref<32x128xf32, #tpu.memory_space<vmem>>, vector<32x128xf32>,
    } else {
    }
    %c0 = arith.constant 0 : index
    %c0_1 = arith.constant 0 : index
    %c0_2 = arith.constant 0 : index
    %3 = vector.load %arg2[%c0, %c0_1, %c0_2] : memref<1x32x256xf32, #tpu.memory_space<vmem>>, vector<1x32x128xf32>
    %4 = vector.shape_cast %3 : vector<1x32x128xf32> to vector<32x128xf32>
    %c0_3 = arith.constant 0 : index
    %c0_4 = arith.constant 0 : index
    %c128 = arith.constant 128 : index
    %5 = vector.load %arg2[%c0_3, %c0_4, %c128] : memref<1x32x256xf32, #tpu.memory_space<vmem>>, vector<1x32x128xf32>
    %6 = vector.shape_cast %5 : vector<1x32x128xf32> to vector<32x128xf32>
    %7 = arith.addf %4, %6 : vector<32x128xf32>
    %8 = arith.maximumf %4, %6 : vector<32x128xf32>
    %c0_5 = arith.constant 0 : index
    %c0_6 = arith.constant 0 : index
    %9 = vector.load %arg8[%c0_5, %c0_6] : memref<32x128xf32, #tpu.memory_space<vmem>>, vector<32x128xf32>
    %10 = arith.addf %9, %7 : vector<32x128xf32>
    %c0_7 = arith.constant 0 : index
    %c0_8 = arith.constant 0 : index
    %11 = vector.load %arg8[%c0_7, %c0_8] : memref<32x128xf32, #tpu.memory_space<vmem>>, vector<32x128xf32>
    tpu.vector_store %arg8[%c0_7, %c0_8], %10 {strides = array<i32>} : memref<32x128xf32, #tpu.memory_space<vmem>>, vector<32x128xf32>,
    %c0_9 = arith.constant 0 : index
    %c0_10 = arith.constant 0 : index
    %12 = vector.load %arg9[%c0_9, %c0_10] : memref<32x128xf32, #tpu.memory_space<vmem>>, vector<32x128xf32>
    %13 = arith.maximumf %12, %8 : vector<32x128xf32>
    %c0_11 = arith.constant 0 : index
    %c0_12 = arith.constant 0 : index
    %14 = vector.load %arg9[%c0_11, %c0_12] : memref<32x128xf32, #tpu.memory_space<vmem>>, vector<32x128xf32>
    tpu.vector_store %arg9[%c0_11, %c0_12], %13 {strides = array<i32>} : memref<32x128xf32, #tpu.memory_space<vmem>>, vector<32x128xf32>,
    %c0_i32_13 = arith.constant 0 : i32
    %15 = arith.cmpi eq, %arg1, %c0_i32_13 : i32
    %16 = arith.extui %15 : i1 to i32
    %c0_i32_14 = arith.constant 0 : i32
    %17 = arith.cmpi ne, %16, %c0_i32_14 : i32
    scf.if %17 {
      %c0_15 = arith.constant 0 : index
      %c0_16 = arith.constant 0 : index
      %18 = vector.load %arg8[%c0_15, %c0_16] : memref<32x128xf32, #tpu.memory_space<vmem>>, vector<32x128xf32>
      %cst = arith.constant dense<0.000000e+00> : vector<32xf32>
      %19 = vector.multi_reduction <add>, %18, %cst [1] : vector<32x128xf32> to vector<32xf32>
      %20 = vector.shape_cast %19 : vector<32xf32> to vector<32x1xf32>
      %cst_17 = arith.constant 3.906250e-03 : f32
      %21 = vector.broadcast %cst_17 : f32 to vector<32x1xf32>
      %22 = arith.mulf %20, %21 : vector<32x1xf32>
      %c0_18 = arith.constant 0 : index
      %c0_19 = arith.constant 0 : index
      %23 = vector.load %arg9[%c0_18, %c0_19] : memref<32x128xf32, #tpu.memory_space<vmem>>, vector<32x128xf32>
      %cst_20 = arith.constant dense<0xFF800000> : vector<32xf32>
      %24 = vector.multi_reduction <maximumf>, %23, %cst_20 [1] : vector<32x128xf32> to vector<32xf32>
      %25 = vector.shape_cast %24 : vector<32xf32> to vector<32x1xf32>
      %26 = tpu.transpose %22, [1, 0] : vector<32x1xf32> -> vector<1x32xf32>
      %27 = tpu.transpose %25, [1, 0] : vector<32x1xf32> -> vector<1x32xf32>
      %28 = tpu.concatenate %26, %27 in 0 : vector<1x32xf32>, vector<1x32xf32> -> vector<2x32xf32>
      %c0_21 = arith.constant 0 : index
      %c0_22 = arith.constant 0 : index
      %29 = vector.load %arg3[%c0_21, %c0_22] : memref<32x2xf32, #tpu.memory_space<vmem>>, vector<32x2xf32>
      %cst_23 = arith.constant dense<0.000000e+00> : vector<2x2xf32>
      %30 = tpu.matmul %28, %29, %cst_23 {dimension_numbers = #tpu.dot_dimension_numbers<[1], [0], [0], [1], [0, 0, 1, 1], [], []>} : vector<2x32xf32>, vector<32x2xf32>, vector<2x2xf32> -> vector<2x2xf32>
      %c0_24 = arith.constant 0 : index
      %c0_25 = arith.constant 0 : index
      %31 = vector.load %arg4[%c0_24, %c0_25] : memref<1x2xf32, #tpu.memory_space<vmem>>, vector<1x2xf32>
      %32 = vector.broadcast %31 : vector<1x2xf32> to vector<2x2xf32>
      %33 = arith.addf %30, %32 : vector<2x2xf32>
      %cst_26 = arith.constant 0.000000e+00 : f32
      %34 = vector.broadcast %cst_26 : f32 to vector<2x2xf32>
      %35 = arith.maximumf %33, %34 : vector<2x2xf32>
      %c0_27 = arith.constant 0 : index
      %c0_28 = arith.constant 0 : index
      %36 = vector.load %arg5[%c0_27, %c0_28] : memref<2x32xf32, #tpu.memory_space<vmem>>, vector<2x32xf32>
      %cst_29 = arith.constant dense<0.000000e+00> : vector<2x32xf32>
      %37 = tpu.matmul %35, %36, %cst_29 {dimension_numbers = #tpu.dot_dimension_numbers<[1], [0], [0], [1], [0, 0, 1, 1], [], []>} : vector<2x2xf32>, vector<2x32xf32>, vector<2x32xf32> -> vector<2x32xf32>
      %c0_30 = arith.constant 0 : index
      %c0_31 = arith.constant 0 : index
      %38 = vector.load %arg6[%c0_30, %c0_31] : memref<1x32xf32, #tpu.memory_space<vmem>>, vector<1x32xf32>
      %39 = vector.broadcast %38 : vector<1x32xf32> to vector<2x32xf32>
      %40 = arith.addf %37, %39 : vector<2x32xf32>
      %41 = vector.extract_strided_slice %40 {offsets = [0, 0], sizes = [1, 32], strides = [1, 1]} : vector<2x32xf32> to vector<1x32xf32>
      %42 = vector.extract_strided_slice %40 {offsets = [1, 0], sizes = [1, 32], strides = [1, 1]} : vector<2x32xf32> to vector<1x32xf32>
      %43 = arith.addf %41, %42 : vector<1x32xf32>
      %44 = arith.negf %43 : vector<1x32xf32>
      %45 = math.exp %44 : vector<1x32xf32>
      %cst_32 = arith.constant 1.000000e+00 : f32
      %46 = vector.broadcast %cst_32 : f32 to vector<1x32xf32>
      %47 = arith.addf %46, %45 : vector<1x32xf32>
      %48 = arith.divf %46, %47 : vector<1x32xf32>
      %c0_33 = arith.constant 0 : index
      %c0_34 = arith.constant 0 : index
      %c0_35 = arith.constant 0 : index
      %49 = vector.load %arg7[%c0_33, %c0_34, %c0_35] : memref<1x1x32xf32, #tpu.memory_space<vmem>>, vector<1x1x32xf32>
      %50 = vector.shape_cast %49 : vector<1x1x32xf32> to vector<1x32xf32>
      %51 = vector.shape_cast %48 : vector<1x32xf32> to vector<1x1x32xf32>
      tpu.vector_store %arg7[%c0_33, %c0_34, %c0_35], %51 {strides = array<i32>} : memref<1x1x32xf32, #tpu.memory_space<vmem>>, vector<1x1x32xf32>,
    } else {
    }
    return
  }
  func.func @transform_0(%arg0: i32, %arg1: i32) -> (i32, i32, i32) {
    %c0_i32 = arith.constant 0 : i32
    %c0_i32_0 = arith.constant 0 : i32
    return %arg0, %c0_i32, %arg1 : i32, i32, i32
  }
  func.func @transform_1(%arg0: i32, %arg1: i32) -> (i32, i32) {
    %c0_i32 = arith.constant 0 : i32
    %c0_i32_0 = arith.constant 0 : i32
    %c0_i32_1 = arith.constant 0 : i32
    return %c0_i32, %c0_i32_0 : i32, i32
  }
  func.func @transform_2(%arg0: i32, %arg1: i32) -> (i32, i32) {
    %c0_i32 = arith.constant 0 : i32
    %c0_i32_0 = arith.constant 0 : i32
    %c0_i32_1 = arith.constant 0 : i32
    return %c0_i32, %c0_i32_0 : i32, i32
  }
  func.func @transform_3(%arg0: i32, %arg1: i32) -> (i32, i32) {
    %c0_i32 = arith.constant 0 : i32
    %c0_i32_0 = arith.constant 0 : i32
    %c0_i32_1 = arith.constant 0 : i32
    return %c0_i32, %c0_i32_0 : i32, i32
  }
  func.func @transform_4(%arg0: i32, %arg1: i32) -> (i32, i32) {
    %c0_i32 = arith.constant 0 : i32
    %c0_i32_0 = arith.constant 0 : i32
    %c0_i32_1 = arith.constant 0 : i32
    return %c0_i32, %c0_i32_0 : i32, i32
  }
  func.func @transform_5(%arg0: i32, %arg1: i32) -> (i32, i32, i32) {
    %c0_i32 = arith.constant 0 : i32
    %c0_i32_0 = arith.constant 0 : i32
    %c0_i32_1 = arith.constant 0 : i32
    return %arg0, %c0_i32, %c0_i32_0 : i32, i32, i32
  }
}

</mosaic_0001>

<bundles_post_ra>
// kernel: tpu_custom_call.1
= control target key start
LH: loop header
LB: loop body
LE: loop exit
PB: predicated region body
PF: predicated region fallthrough
CT: control target
= control target key end

     0   :  { %10 = vsyncpa [#allocation5], 0  ;;  %s1103_s0 = inlined_call_operand.hbm [shape: f32[2,32,256], index: 0, kind: input, shape index: {}]   ;;  %s1104_s1 = inlined_call_operand.vmem [shape: f32[32,2], index: 1, kind: input, shape index: {}]   ;;  %s1105_s2 = inlined_call_operand.vmem [shape: f32[1,2], index: 2, kind: input, shape index: {}]   ;;  %s1106_s3 = inlined_call_operand.vmem [shape: f32[2,32], index: 3, kind: input, shape index: {}]   ;;  %s1107_s4 = inlined_call_operand.vmem [shape: f32[1,32], index: 4, kind: input, shape index: {}]   ;;  %s1108_s5 = inlined_call_operand.hbm [shape: f32[2,1,32], index: 5, kind: output, shape index: {}]  }
   0x1   :  { %12 = vsyncpa [#allocation5 + $0x1], 0 }
   0x2   :  { %13 = vsyncpa [#allocation6], 0 }
   0x3   :  { %15 = vsyncpa [#allocation6 + $0x1], 0  ;;  %s943_s18 = smov 0   ;;  %s945_s19 = smov 0  }
   0x4   :  { %s947_s20 = smov 0   ;;  %s949_s21 = smov 0  }
   0x5   :  { %s951_s22 = smov 0   ;;  %s953_s23 = smov 0  }
   0x6 LB: > { %s685_s24 = sadd.s32 4294967295, %s905_s23   ;;  %s686_s25 = sadd.s32 4294967294, %s905_s23   ;;  %s905_s23 = sphi %s953_s23, %s21_s23   ;;  %s901_s22 = sphi %s951_s22, %s1119_s22   ;;  %s897_s21 = sphi %s949_s21, %s1118_s21   ;;  %s893_s20 = sphi %s947_s20, %s1117_s20   ;;  %s889_s19 = sphi %s945_s19, %s1116_s19   ;;  %s885_s18 = sphi %s943_s18, %s1115_s18  }
   0x7   : > { %s33_s26 = sadd.s32 1, %s901_s22  ;;  %s42_s27 = sadd.s32 1, %s893_s20 }
   0x8   : > { %p35_p0 = scmp.ge.s32.totalorder %s33_s26, 2  ;;  %p49_p1 = scmp.ne.s32.totalorder %s893_s20, %s889_s19 }
   0x9   : > { %p50_p2 = scmp.eq.s32.totalorder %s905_s23, 0  ;;  %p55_p3 = scmp.ne.s32.totalorder %s889_s19, %s885_s18 }
   0xa   : > { %s1121_s26 = smov (%p35_p0, %s33_s26), 0  ;;  %p56_p5 = scmp.eq.s32.totalorder %s685_s24, 0 }
   0xb   : > { %p984_p4 = por %p50_p2, %p49_p1  ;;  %s37_s29 = ssub.s32 %s901_s22, %s1121_s26 }
   0xc   : > { %p163_p6 = scmp.eq.s32.totalorder %s685_s24, 1  ;;  %p40_p7 = scmp.eq.s32.totalorder %s37_s29, 0 }
   0xd   : > { %p990_p8 = por %p56_p5, %p55_p3  ;;  %p169_p10 = scmp.eq.s32.totalorder %s686_s25, 1 }
   0xe   : > { %p994_p9 = por %p163_p6, %p49_p1  ;;  %p739_p13 = scmp.lt.s32.totalorder %s905_s23, 2 }
   0xf   : > { %s999_s7 = scalar_select %p40_p7, %s893_s20, %s42_s27  }
  0x10   : > { %p1001_p11 = por %p169_p10, %p55_p3  ;;  %s201_s9 = sand.u32 1, %s893_s20  }
  0x11   : > { %s689_s10 = sshll.u32 %s201_s9, 6  ;;  %s703_s11 = sshll.u32 %s901_s22, 10 }
  0x12   : > { %s213_s14 = scalar_lea.hbm %s1103_s0, %s703_s11  ;;  %s205_s15 = scalar_lea.vmem [#allocation4], %s689_s10 }
  0x13   : > { %s214_s16 = sshll.u32 %s205_s15, 4  ;;  %p1014_p0 = pnand %p739_p13, %p984_p4  ;;  %s215_s16 = int_to_ptr.vmem [resolvable:$true] %s214_s16 }
  0x14   : > { %p692_p1 = scmp.ge.s32.totalorder %s905_s23, 1  ;;  %s202_s24 = scalar_lea.sflag [#allocation5], %s201_s9 }
  0x15   : > { %p799_p2 = pneg %p1014_p0  ;;  %s810_s25 = scalar_lea.vmem %s215_s16, 1024 }
  0x16   : > { %p811_p3 = scmp.ne.s32.totalorder %s215_s16, %s810_s25  ;;  %s907_s27 = smov [#allocation4]  }
  0x17   : > { %s815_s29 = sshll.u32 %s907_s27, 4  ;;  %s816_s29 = int_to_ptr.vmem [resolvable:$false] %s815_s29 }
  0x18   : > { %p813_p5 = pnand %p811_p3, %p799_p2  ;;  %s817_s10 = scalar_lea.vmem %s816_s29, 2048 }
  0x19   : > { %p818_p7 = scmp.lt.s32.totalorder %s215_s16, %s816_s29  ;;  %p819_p10 = scmp.lt.s32.totalorder %s817_s10, %s810_s25 }
  0x1a   : > { %p814_p6 = pneg %p813_p5 }
  0x1b   : > { %p820_p12 = por %p819_p10, %p818_p7 }
  0x1d   : > { %p821_p4 = pnand %p820_p12, %p814_p6 }
  0x1f   : > { %824 = shalt.err (!%p821_p4)
}
  0x20   : > { %s908_s28 = smov 256   ;;  %s909_s9 = smov 16  }
  0x21   : > { %734 = dma.hbm_to_vmem [thread:$0]  (!%p1014_p0), %s213_s14, 1024, %s215_s16, %s202_s24, %s908_s28, %s908_s28, %s909_s9  }
  0x22   : > { %p222_p13 = scmp.lt.s32.totalorder %s905_s23, 3 }
  0x24   : > { %p223_p2 = pnand %p692_p1, %p222_p13 }
  0x25   : > { %s1027_s11 = sand.u32 (!%p223_p2), 1, %s889_s19  }
  0x26   : > { %226 = sbr.rel (%p223_p2) target bundleno = 758 (0x2f6), region = 40  ;;  %s693_s12 = sshll.u32 (!%p223_p2), %s1027_s11, 6 }
  0x27   : > { %s229_s13 = scalar_lea.sflag (!%p223_p2), [#allocation5], %s1027_s11  ;;  %s232_s15 = scalar_lea.vmem (!%p223_p2), [#allocation4], %s693_s12 }
  0x2b   : > { %876 = dma.done.wait (%p990_p8), %s229_s13, 1024  }
  0x2c   : > { %878 = vsyncadd (%p990_p8), %s229_s13, 4294966272  ;;  %v271_v0 = vld [vmem:[%s232_s15] sm:$0xff]  ;;  %v275_v1 = vld [vmem:[%s232_s15 + $0x8] sm:$0xff]  ;;  %v910_v17 = vmov 0.0   ;;  %vm911_vm0 = vmmov 0   ;;  %vm409_vm1 = vcmask 1040384  }
  0x2d   : > { %v272_v2 = vld [vmem:[%s232_s15 + $0x10] sm:$0xff]  ;;  %v279_v3 = vadd.f32 %v275_v1, %v271_v0  ;;  %v276_v4 = vld [vmem:[%s232_s15 + $0x18] sm:$0xff]  ;;  %v283_v6 = vmax.f32 %v271_v0, %v275_v1  ;;  %v273_v8 = vld [vmem:[%s232_s15 + $0x20] sm:$0xff]  ;;  %711 = vmatprep.subr.mxu0 %v910_v17  ;;  %722 = vmatprep.subr.mxu1 %v910_v17  ;;  %vm422_vm2 = vcmask 261120   ;;  %vm509_vm3 = vcmask 1041408   ;;  %s700_s30 = sshll.u32 %s897_s21, 4 }
  0x2e   : > { %v280_v5 = vadd.f32 %v276_v4, %v272_v2  ;;  %v284_v7 = vmax.f32 %v272_v2, %v276_v4  ;;  %v277_v9 = vld [vmem:[%s232_s15 + $0x28] sm:$0xff]  ;;  %v274_v12 = vld [vmem:[%s232_s15 + $0x30] sm:$0xff]  ;;  %v278_v13 = vld [vmem:[%s232_s15 + $0x38] sm:$0xff]  ;;  %719 = vmatprep.mubr.msk.f32.mxu0 %vm911_vm0, %v910_v17  ;;  %724 = vmatprep.mubr.msk.f32.mxu1 %vm911_vm0, %v910_v17  ;;  %vm505_vm4 = vcmask 15360   ;;  %s257_s14 = scalar_lea.vmem [#allocation7], %s1027_s11  ;;  %vm593_vm5 = vcmask 253952   ;;  %s1061_s25 = scalar_lea.hbm %s1108_s5, %s700_s30 }
  0x2f   : > { %318 = vadd.xlane.f32.xlu0 %v279_v3  ;;  %v281_v10 = vadd.f32 %v277_v9, %v273_v8  ;;  %v285_v11 = vmax.f32 %v273_v8, %v277_v9  ;;  %v282_v14 = vadd.f32 %v278_v13, %v274_v12  ;;  %v286_v15 = vmax.f32 %v274_v12, %v278_v13  ;;  %v414_v16 = vld [vmem:[%s1104_s1 + $0x18] sm:$0xff]  ;;  %v413_v18 = vld [vmem:[%s1104_s1 + $0x10] sm:$0xff]  ;;  %v412_v22 = vld [vmem:[%s1104_s1 + $0x8] sm:$0xff]  ;;  %s608_s16 = sshll.u32 %s257_s14, 4  ;;  %s596_s27 = scalar_lea.sflag [#allocation6], %s1027_s11  ;;  %s609_s16 = int_to_ptr.vmem [resolvable:$true] %s608_s16 }
  0x30   : > { %320 = vadd.xlane.f32.xlu1 %v280_v5  ;;  %712 = vmatpush3.msra.mxu0 %v414_v16  ;;  %v411_v24 = vld [vmem:[%s1104_s1] sm:$0xff]  ;;  %s825_s29 = scalar_lea.vmem %s609_s16, 16  ;;  %s912_s10 = smov [#allocation7]  }
  0x31   : > { %713 = vmatprep.subr.mxu0 %v910_v17  ;;  %v497_v37 = vld [vmem:[%s1106_s3] sm:$0x3]  ;;  %p826_p8 = scmp.ne.s32.totalorder %s609_s16, %s825_s29  ;;  %s829_s28 = sshll.u32 %s912_s10, 4  ;;  %s830_s28 = int_to_ptr.vmem [resolvable:$false] %s829_s28 }
  0x32   : > { %714 = vmatpush3.msra.mxu0 %v413_v18  ;;  %723 = vmatpush3.msk.msra.mxu1 %vm509_vm3, %v497_v37  ;;  %v694_v38 = vld [vmem:[%s1105_s2] ss:$0 sm:$0xff]  ;;  %s831_s21 = scalar_lea.vmem %s830_s28, 32  ;;  %p832_p1 = scmp.lt.s32.totalorder %s609_s16, %s830_s28 }
  0x33   : > { %334 = vmax.xlane.f32.xlu0 %v283_v6  ;;  %715 = vmatprep.subr.mxu0 %v910_v17  ;;  %v696_v43 = vld [vmem:[%s1107_s4] ss:$0 sm:$0xff]  ;;  %p827_p12 = pnand %p826_p8, %p994_p9  ;;  %p833_p3 = scmp.lt.s32.totalorder %s831_s21, %s825_s29 }
  0x34   : > { %336 = vmax.xlane.f32.xlu1 %v284_v7  ;;  %716 = vmatpush3.msra.mxu0 %v412_v22 }
  0x35   : > { %717 = vmatprep.subr.mxu0 %v910_v17  ;;  %p828_p0 = pneg %p827_p12  ;;  %p834_p5 = por %p833_p3, %p832_p1 }
  0x36   : > { %718 = vmatpush3.msra.mxu0 %v411_v24 }
  0x37   : > { %322 = vadd.xlane.f32.xlu0 %v281_v10  ;;  %p835_p6 = pnand %p834_p5, %p828_p0 }
  0x38   : > { %338 = vmax.xlane.f32.xlu1 %v285_v11 }
  0x3b   : > { %324 = vadd.xlane.f32.xlu0 %v282_v14 }
  0x3c   : > { %340 = vmax.xlane.f32.xlu1 %v286_v15 }
  0xb8   : > { %v319_v19 = vpop.xlane.xlu0 %318 }
  0xb9   : > { %v326_v20 = vmul.f32 0.00390625, %v319_v19  ;;  %v321_v21 = vpop.xlane.xlu1 %320 }
  0xba   : > { %v327_v23 = vmul.f32 0.00390625, %v321_v21 }
  0xbb   : > { %342 = vxpose.xlu1.b32.start [1/4] (short) (narrow) %v326_v20, 8 }
  0xbc   : > { %v335_v25 = vpop.xlane.xlu0 %334 }
  0xbd   : > { %374 = vxpose.xlu0.b32.start [1/4] (short) (narrow) %v335_v25, 8  ;;  %v337_v26 = vpop.xlane.xlu1 %336 }
  0xbf   : > { %343 = vxpose.xlu1.b32.cont [2/4] (short) (narrow) %v327_v23, 8 }
  0xc0   : > { %v323_v27 = vpop.xlane.xlu0 %322 }
  0xc1   : > { %375 = vxpose.xlu0.b32.cont [2/4] (short) (narrow) %v337_v26, 8  ;;  %v339_v28 = vpop.xlane.xlu1 %338  ;;  %v328_v29 = vmul.f32 0.00390625, %v323_v27 }
  0xc3   : > { %344 = vxpose.xlu1.b32.cont [3/4] (short) (narrow) %v328_v29, 8 }
  0xc4   : > { %v325_v30 = vpop.xlane.xlu0 %324 }
  0xc5   : > { %376 = vxpose.xlu0.b32.cont [3/4] (short) (narrow) %v339_v28, 8  ;;  %v329_v31 = vmul.f32 0.00390625, %v325_v30  ;;  %v341_v32 = vpop.xlane.xlu1 %340 }
  0xc7   : > { %345 = vxpose.xlu1.b32.end [4/4] (short) (narrow) %v329_v31, 8 }
  0xc9   : > { %377 = vxpose.xlu0.b32.end [4/4] (short) (narrow) %v341_v32, 8 }
 0x137   : > { %v358_v34 = vpop.trf.xlu1 }
 0x139   : > { %v390_v33 = vpop.trf.xlu0 }
 0x13a   : > { %v407_v35 = vrot.slane %v390_v33, 7 }
 0x13c   : > { %v410_v36 = vsel %vm409_vm1, %v358_v34, %v407_v35 }
 0x13d   : > { %720 = vmatmul.mubr.msk.f32.vlgmr.msra.gmra.mxu0 %vm422_vm2, %v410_v36 }
 0x1fd   : > { %v492_v39 = vpop.f32.mrf.mxu0 }
 0x1fe   : > { %v493_v40 = vadd.f32 %v694_v38, %v492_v39 }
 0x1ff   : > { %v721_v41 = vpop.f32.mrf.mxu0 }
 0x200   : > { %v496_v42 = vmax.f32 %v493_v40, 0.0 }
 0x202   : > { %725 = vmatmul.mubr.msk.f32.vlgmr.msra.gmra.mxu1 %vm505_vm4, %v496_v42 }
 0x2c2   : > { %v579_v44 = vpop.f32.mrf.mxu1 }
 0x2c3   : > { %v580_v45 = vadd.f32 %v696_v43, %v579_v44 }
 0x2c4   : > { %v726_v46 = vpop.f32.mrf.mxu1 }
 0x2c5   : > { %v584_v47 = vrot.slane %v580_v45, 1 }
 0x2c7   : > { %v586_v48 = vadd.f32 %v584_v47, %v580_v45 }
 0x2c9   : > { %v699_v49 = vmul.f32 -1.442695, %v586_v48 }
 0x2cb   : > { %793 = vpow2.f32 %v699_v49 }
 0x2d8   : > { %v794_v50 = vpop.eup %793 }
 0x2d9   : > { %v590_v51 = vadd.f32 1.0, %v794_v50 }
 0x2db   : > { %795 = vrcp.f32 %v590_v51 }
 0x2e8   : > { %v796_v52 = vpop.eup %795 }
 0x2e9   : > { %594 = vst.msk [vmem:[%s257_s14] sm:$0x1] %vm593_vm5, %v796_v52 }
 0x2ea   : > { %838 = shalt.err (!%p835_p6)
}
 0x2eb   : > { %s839_s9 = scalar_lea.hbm %s1061_s25, 16  ;;  %s843_s13 = scalar_lea.hbm %s1108_s5, 32 }
 0x2ec   : > { %p840_p7 = scmp.ne.s32.totalorder %s1061_s25, %s839_s9  ;;  %p844_p13 = scmp.lt.s32.totalorder %s1061_s25, %s1108_s5 }
 0x2ed   : > { %p845_p2 = scmp.lt.s32.totalorder %s843_s13, %s839_s9 }
 0x2ee   : > { %p841_p10 = pnand %p840_p7, %p994_p9 }
 0x2ef   : > { %p846_p8 = por %p845_p2, %p844_p13 }
 0x2f0   : > { %p842_p4 = pneg %p841_p10 }
 0x2f2   : > { %p847_p12 = pnand %p846_p8, %p842_p4 }
 0x2f4   : > { %850 = shalt.err (!%p847_p12)
}
 0x2f5   : > { %729 = dma.vmem_to_hbm [thread:$0]  (%p994_p9), %s609_s16, 16, %s1061_s25, %s596_s27  }
 0x2f6 PF: > { %s620_s14 = sand.u32 1, %s885_s18   ;;  %p1114_p0 = scmp.ge.s32.totalorder %s905_s23, 2 }
 0x2f7   : > { %s621_s17 = scalar_lea.sflag [#allocation6], %s620_s14 }
 0x2f8   : > { %p736_p1 = pnand %p1114_p0, %p1001_p11 }
 0x2fa   : > { %p737_p3 = pneg %p736_p1 }
 0x2fc   : > { %880 = dma.done.wait (%p737_p3), %s621_s17, 16  }
 0x2fd   : > { %882 = vsyncadd (%p737_p3), %s621_s17, 4294967280  ;;  %s21_s23 = sadd.s32 1, %s905_s23   ;;  %s1115_s18 = smov %s889_s19 }
 0x2fe   : > { %p18_p5 = scmp.ge.s32.totalorder %s21_s23, 4   ;;  %s1116_s19 = smov %s893_s20 }
 0x2ff   : > { %s1117_s20 = smov %s999_s7  ;;  %s1118_s21 = smov %s901_s22 }
 0x300   : > { %s1119_s22 = smov %s1121_s26  ;;  %20 = sbr.rel (!%p18_p5) target bundleno = 6 (0x6), region = 93 }
 0x305   :  { %625 = vsyncpa [#allocation5], 1 }
 0x306   :  { %627 = vsyncpa [#allocation5 + $0x1], 1 }
 0x307   :  { %628 = vsyncpa [#allocation6], 1 }
 0x308   :  { %630 = vsyncpa [#allocation6 + $0x1], 1 }

</bundles_post_ra>
